<compile_context>
chip_gen: v5e
topology: v5e:2x2
jax: 0.10.0
libtpu: 0.0.40
codegen_flags: <defaults>
</compile_context>

<pallas_src>
import functools

import jax
import jax.numpy as jnp
from jax import lax
from jax.experimental import pallas as pl
from jax.experimental.pallas import tpu as pltpu

_LANES = 128
_BLOCK_BUDGET_BYTES = 2 * 1024 * 1024  # per block; ~4x live with in+out double-buffered


# ---------------------------------------------------------------------------
# Fused single-pass kernel: per-row stats + apply from one VMEM-resident block.
# ---------------------------------------------------------------------------
def _fused_kernel(x_ref, o_ref):
    x = x_ref[...]                                            # (TB, R, 128)
    # Sublane axis (1) first -> cheap VPU min/max; one XLU lane-reduce per row.
    mn = jnp.min(jnp.min(x, axis=1, keepdims=True), axis=2, keepdims=True)
    mx = jnp.max(jnp.max(x, axis=1, keepdims=True), axis=2, keepdims=True)
    const = mx == mn                                          # per-row gate
    shift = jnp.where(const, 0.0, mn + mx)                    # (TB, 1, 1)
    inv = jnp.where(const, 0.5, 1.0 / (mx - mn))              # one divide per row
    o_ref[...] = ((2.0 * x - shift) * inv).astype(o_ref.dtype)


# ---------------------------------------------------------------------------
# Two-pass fallback (samples too large for a single VMEM block).
# ---------------------------------------------------------------------------
def _stats_kernel(x_ref, mn_ref, mx_ref, *, rows_total, tile_rows, mask_tail):
    j = pl.program_id(1)
    x = x_ref[...]                                            # (TB, TR, 128)
    if mask_tail:
        rows_left = rows_total - j * tile_rows
        in_bounds = lax.broadcasted_iota(jnp.int32, x.shape, 1) < rows_left
        x_mn = jnp.where(in_bounds, x, jnp.asarray(jnp.inf, x.dtype))
        x_mx = jnp.where(in_bounds, x, jnp.asarray(-jnp.inf, x.dtype))
    else:
        x_mn = x_mx = x
    tile_mn = jnp.min(jnp.min(x_mn, axis=1, keepdims=True), axis=2, keepdims=True)
    tile_mx = jnp.max(jnp.max(x_mx, axis=1, keepdims=True), axis=2, keepdims=True)

    @pl.when(j == 0)
    def _():
        mn_ref[...] = tile_mn
        mx_ref[...] = tile_mx

    @pl.when(j != 0)
    def _():
        mn_ref[...] = jnp.minimum(mn_ref[...], tile_mn)
        mx_ref[...] = jnp.maximum(mx_ref[...], tile_mx)


def _apply_kernel(shift_ref, inv_ref, x_ref, o_ref):
    # Branch-free: the pass-through case is already folded into shift/inv.
    o_ref[...] = ((2.0 * x_ref[...] - shift_ref[...]) * inv_ref[...]).astype(o_ref.dtype)


def _batch_tile(b, max_tb):
    tb = max(1, min(b, max_tb))
    if b >= 2:
        tb = min(tb, -(-b // 2))  # keep >= 2 parallel batch blocks (v7x dual-TC)
    return tb


@jax.jit
def range_norm(x):
    """RangeNorm forward. x: (B, ...) float; per-sample min/max range norm."""
    shape_ = x.shape
    b = shape_[0]
    f = 1
    for d in shape_[1:]:
        f *= d
    itemsize = x.dtype.itemsize

    # ---- Lane-dense repack to (B, R, 128); pad the tail with an in-range
    # value (the sample's own first element) so per-row min/max are unaffected.
    f_pad = pl.cdiv(f, _LANES) * _LANES
    x2 = x.reshape(b, f)
    if f_pad != f:
        # TODO(synk): an in-kernel lane mask would avoid this pad copy.
        fill = jnp.broadcast_to(x2[:, :1], (b, f_pad - f))
        x2 = jnp.concatenate([x2, fill], axis=1)
    r = f_pad // _LANES
    x3 = x2.reshape(b, r, _LANES)

    sample_bytes = r * _LANES * itemsize

    if sample_bytes <= _BLOCK_BUDGET_BYTES:
        # ---- Fused single-pass: stats + apply from one VMEM-resident block.
        tb = _batch_tile(b, max(1, _BLOCK_BUDGET_BYTES // sample_bytes))
        nb = pl.cdiv(b, tb)
        out3 = pl.pallas_call(
            _fused_kernel,
            out_shape=jax.ShapeDtypeStruct((b, r, _LANES), x3.dtype),
            grid_spec=pltpu.PrefetchScalarGridSpec(
                num_scalar_prefetch=0,
                grid=(nb,),
                in_specs=[pl.BlockSpec((tb, r, _LANES), lambda i: (i, 0, 0))],
                out_specs=pl.BlockSpec((tb, r, _LANES), lambda i: (i, 0, 0)),
            ),
            compiler_params=pltpu.CompilerParams(
                dimension_semantics=("parallel",)),
        )(x3)
    else:
        # ---- Two-pass fallback for very large samples.
        tb = _batch_tile(b, 8)
        tr = _BLOCK_BUDGET_BYTES // (tb * _LANES * itemsize)
        if tr >= r:
            tr = r
        else:
            tr = max(8, (tr // 8) * 8)        # (8,128) tiling constraint
        nb = pl.cdiv(b, tb)
        nr = pl.cdiv(r, tr)
        mask_tail = (r % tr) != 0

        stats = functools.partial(
            _stats_kernel, rows_total=r, tile_rows=tr, mask_tail=mask_tail)
        row_mn, row_mx = pl.pallas_call(
            stats,
            out_shape=(
                jax.ShapeDtypeStruct((b, 1, 1), x3.dtype),
                jax.ShapeDtypeStruct((b, 1, 1), x3.dtype),
            ),
            grid_spec=pltpu.PrefetchScalarGridSpec(
                num_scalar_prefetch=0,
                grid=(nb, nr),
                in_specs=[pl.BlockSpec((tb, tr, _LANES), lambda i, j: (i, j, 0))],
                out_specs=[
                    pl.BlockSpec((tb, 1, 1), lambda i, j: (i, 0, 0)),
                    pl.BlockSpec((tb, 1, 1), lambda i, j: (i, 0, 0)),
                ],
            ),
            compiler_params=pltpu.CompilerParams(
                dimension_semantics=("parallel", "arbitrary")),
        )(x3)

        # Tiny (B,1,1) prep: fold the pass-through gate into shift/inv and
        # hoist the divide out of the hot loop (one divide per row).
        const = row_mx == row_mn
        shift = jnp.where(const, 0.0, row_mn + row_mx)
        inv = jnp.where(const, 0.5, 1.0 / (row_mx - row_mn))

        out3 = pl.pallas_call(
            _apply_kernel,
            out_shape=jax.ShapeDtypeStruct((b, r, _LANES), x3.dtype),
            grid_spec=pltpu.PrefetchScalarGridSpec(
                num_scalar_prefetch=0,
                grid=(nb, nr),
                in_specs=[
                    pl.BlockSpec((tb, 1, 1), lambda i, j: (i, 0, 0)),
                    pl.BlockSpec((tb, 1, 1), lambda i, j: (i, 0, 0)),
                    pl.BlockSpec((tb, tr, _LANES), lambda i, j: (i, j, 0)),
                ],
                out_specs=pl.BlockSpec((tb, tr, _LANES), lambda i, j: (i, j, 0)),
            ),
            compiler_params=pltpu.CompilerParams(
                dimension_semantics=("parallel", "parallel")),
        )(shift, inv, x3)

    out2 = out3.reshape(b, f_pad)
    if f_pad != f:
        out2 = out2[:, :f]
    return out2.reshape(shape_)


def _range_norm_ref(x):
    # Pure-JAX mirror of the PyTorch module (unbiased std over all elements).
    std = jnp.std(x, ddof=1)
    shape_ = x.shape
    x_ = x.reshape(shape_[0], -1)
    mn = jnp.min(x_, axis=-1, keepdims=True)
    mx = jnp.max(x_, axis=-1, keepdims=True)
    y = ((2.0 * x_ - (mn + mx)) / (mx - mn)).reshape(shape_)
    return jnp.where(std == 0.0, x, y)


if __name__ == "__main__":
    key = jax.random.PRNGKey(0)
    B, C, H, W = 2, 4, 16, 16
    x = jax.random.normal(key, (B, C, H, W), dtype=jnp.float32)

    out = range_norm(x)
    jax.block_until_ready(out)
    ref = _range_norm_ref(x)
    assert out.shape == x.shape and out.dtype == x.dtype
    assert jnp.allclose(out, ref, atol=1e-5, rtol=1e-5), "mismatch vs reference"

    # std == 0 branch: constant input must pass through unchanged (bit-exact).
    x_const = jnp.full((B, C, H, W), 3.0, dtype=jnp.float32)
    out_const = range_norm(x_const)
    jax.block_until_ready(out_const)
    assert jnp.array_equal(out_const, x_const), "constant input must be identity"

    # Sample size not a multiple of 128 -> lane-dense padded path.
    x_odd = jax.random.normal(jax.random.PRNGKey(1), (2, 3, 5, 7), dtype=jnp.float32)
    out_odd = range_norm(x_odd)
    jax.block_until_ready(out_odd)
    assert jnp.allclose(out_odd, _range_norm_ref(x_odd), atol=1e-5, rtol=1e-5), \
        "mismatch on non-128-multiple sample size"

    # Large sample (> 2 MiB) -> two-pass tiled fallback with masked tail tile.
    x_big = jax.random.normal(jax.random.PRNGKey(2), (2, 8, 256, 320), dtype=jnp.float32)
    out_big = range_norm(x_big)
    jax.block_until_ready(out_big)
    assert jnp.allclose(out_big, _range_norm_ref(x_big), atol=1e-5, rtol=1e-5), \
        "mismatch on two-pass fallback path"

    print("KERNEL_OK")
</pallas_src>

<mosaic_0001>
module attributes {stable_mosaic.version = 11 : i64} {
  func.func @_fused_kernel(%arg0: i32, %arg1: memref<1x8x128xf32, #tpu.memory_space<vmem>>, %arg2: memref<1x8x128xf32, #tpu.memory_space<vmem>>) attributes {dimension_semantics = [#tpu.dimension_semantics<parallel>], iteration_bounds = array<i64: 2>, scalar_prefetch = 0 : i64, scratch_operands = 0 : i64, tpu.core_type = #tpu.core_type<tc>, window_params = [{transform_indices = @transform_0, window_bounds = array<i64: 1, 8, 128>}, {transform_indices = @transform_1, window_bounds = array<i64: 1, 8, 128>}]} {
    %c0 = arith.constant 0 : index
    %c0_0 = arith.constant 0 : index
    %c0_1 = arith.constant 0 : index
    %0 = vector.load %arg1[%c0, %c0_0, %c0_1] : memref<1x8x128xf32, #tpu.memory_space<vmem>>, vector<1x8x128xf32>
    %cst = arith.constant dense<0x7F800000> : vector<1x128xf32>
    %1 = vector.multi_reduction <minimumf>, %0, %cst [1] : vector<1x8x128xf32> to vector<1x128xf32>
    %2 = vector.shape_cast %1 : vector<1x128xf32> to vector<1x1x128xf32>
    %cst_2 = arith.constant dense<0x7F800000> : vector<1x1xf32>
    %3 = vector.multi_reduction <minimumf>, %2, %cst_2 [2] : vector<1x1x128xf32> to vector<1x1xf32>
    %4 = vector.shape_cast %3 : vector<1x1xf32> to vector<1x1x1xf32>
    %cst_3 = arith.constant dense<0xFF800000> : vector<1x128xf32>
    %5 = vector.multi_reduction <maximumf>, %0, %cst_3 [1] : vector<1x8x128xf32> to vector<1x128xf32>
    %6 = vector.shape_cast %5 : vector<1x128xf32> to vector<1x1x128xf32>
    %cst_4 = arith.constant dense<0xFF800000> : vector<1x1xf32>
    %7 = vector.multi_reduction <maximumf>, %6, %cst_4 [2] : vector<1x1x128xf32> to vector<1x1xf32>
    %8 = vector.shape_cast %7 : vector<1x1xf32> to vector<1x1x1xf32>
    %9 = arith.cmpf oeq, %8, %4 : vector<1x1x1xf32>
    %10 = arith.addf %4, %8 : vector<1x1x1xf32>
    %cst_5 = arith.constant 0.000000e+00 : f32
    %11 = vector.broadcast %cst_5 : f32 to vector<1x1x1xf32>
    %12 = arith.select %9, %11, %10 : vector<1x1x1xi1>, vector<1x1x1xf32>
    %13 = arith.subf %8, %4 : vector<1x1x1xf32>
    %cst_6 = arith.constant 1.000000e+00 : f32
    %14 = vector.broadcast %cst_6 : f32 to vector<1x1x1xf32>
    %15 = arith.divf %14, %13 : vector<1x1x1xf32>
    %cst_7 = arith.constant 5.000000e-01 : f32
    %16 = vector.broadcast %cst_7 : f32 to vector<1x1x1xf32>
    %17 = arith.select %9, %16, %15 : vector<1x1x1xi1>, vector<1x1x1xf32>
    %cst_8 = arith.constant 2.000000e+00 : f32
    %18 = vector.broadcast %cst_8 : f32 to vector<1x8x128xf32>
    %19 = arith.mulf %18, %0 : vector<1x8x128xf32>
    %20 = vector.broadcast %12 : vector<1x1x1xf32> to vector<1x8x128xf32>
    %21 = arith.subf %19, %20 : vector<1x8x128xf32>
    %22 = vector.broadcast %17 : vector<1x1x1xf32> to vector<1x8x128xf32>
    %23 = arith.mulf %21, %22 : vector<1x8x128xf32>
    %c0_9 = arith.constant 0 : index
    %c0_10 = arith.constant 0 : index
    %c0_11 = arith.constant 0 : index
    %24 = vector.load %arg2[%c0_9, %c0_10, %c0_11] : memref<1x8x128xf32, #tpu.memory_space<vmem>>, vector<1x8x128xf32>
    tpu.vector_store %arg2[%c0_9, %c0_10, %c0_11], %23 {strides = array<i32>} : memref<1x8x128xf32, #tpu.memory_space<vmem>>, vector<1x8x128xf32>,
    return
  }
  func.func @transform_0(%arg0: i32) -> (i32, i32, i32) {
    %c0_i32 = arith.constant 0 : i32
    %c0_i32_0 = arith.constant 0 : i32
    %c0_i32_1 = arith.constant 0 : i32
    return %arg0, %c0_i32, %c0_i32_0 : i32, i32, i32
  }
  func.func @transform_1(%arg0: i32) -> (i32, i32, i32) {
    %c0_i32 = arith.constant 0 : i32
    %c0_i32_0 = arith.constant 0 : i32
    %c0_i32_1 = arith.constant 0 : i32
    return %arg0, %c0_i32, %c0_i32_0 : i32, i32, i32
  }
}

</mosaic_0001>

<bundles_post_ra>
// kernel: range_norm.1
= control target key start
LH: loop header
LB: loop body
LE: loop exit
PB: predicated region body
PF: predicated region fallthrough
CT: control target
= control target key end

     0   :  { %s243_s6 = smov 0   ;;  %s269_s0 = inlined_call_operand.vmem [shape: f32[2,8,128], index: 0, kind: input, shape index: {}]   ;;  %s270_s1 = inlined_call_operand.vmem [shape: f32[2,8,128], index: 1, kind: output, shape index: {}]  }
   0x1 LB: > { %s206_s7 = sadd.s32 4294967295, %s231_s6   ;;  %p210_p0 = scmp.ge.s32.totalorder %s231_s6, 1  ;;  %s231_s6 = sphi %s243_s6, %s11_s6  }
   0x2   : > { %p86_p1 = scmp.lt.s32.totalorder %s231_s6, 3 }
   0x4   : > { %p87_p2 = pnand %p210_p0, %p86_p1 }
   0x5   : > { %p104_p3 = scmp.lt.s32.totalorder (!%p87_p2), %s206_s7, 1 }
   0x6   : > { %90 = sbr.rel (%p87_p2) target bundleno = 174 (0xae), region = 24 }
   0xb   : > { %s272_s7 = smov (!%p104_p3, %s206_s7), 1 }
   0xc   : > { %s211_s8 = sshll.u32 %s272_s7, 3 }
   0xd   : > { %s107_s11 = scalar_lea.vmem %s269_s0, %s211_s8  ;;  %s111_s14 = scalar_lea.vmem %s270_s1, %s211_s8 }
   0xe   : > { %v112_v0 = vld [vmem:[%s107_s11] sm:$0xff] }
   0xf   : > { %v113_v1 = vrot.slane %v112_v0, 4  ;;  %v149_v22 = vmul.f32 2.0, %v112_v0 }
  0x11   : > { %v114_v2 = vmin.f32 %v112_v0, %v113_v1  ;;  %v122_v3 = vmax.f32 %v112_v0, %v113_v1 }
  0x13   : > { %v115_v4 = vrot.slane %v114_v2, 2  ;;  %v123_v5 = vrot.slane %v122_v3, 2 }
  0x15   : > { %v116_v6 = vmin.f32 %v114_v2, %v115_v4  ;;  %v124_v8 = vmax.f32 %v122_v3, %v123_v5 }
  0x17   : > { %v117_v7 = vrot.slane %v116_v6, 1  ;;  %v125_v10 = vrot.slane %v124_v8, 1 }
  0x19   : > { %v118_v9 = vmin.f32 %v116_v6, %v117_v7  ;;  %v126_v11 = vmax.f32 %v124_v8, %v125_v10 }
  0x1b   : > { %119 = vmin.xlane.f32.xlu0 %v118_v9 }
  0x23   : > { %127 = vmax.xlane.f32.xlu0 %v126_v11 }
  0x8e   : > { %v120_v12 = vpop.xlane.xlu0 %119 }
  0x96   : > { %v128_v13 = vpop.xlane.xlu0 %127 }
  0x97   : > { %v132_v14 = vsub.f32 %v128_v13, %v120_v12  ;;  %v130_v17 = vadd.f32 %v128_v13, %v120_v12  ;;  %vm129_vm0 = vcmp.eq.f32.partialorder %v128_v13, %v120_v12 }
  0x99   : > { %223 = vrcp.f32 %v132_v14  ;;  %v144_v19 = vand.u32 2147483648, %v132_v14  ;;  %v142_v21 = vand.u32 2147483647, %v132_v14  ;;  %v131_v23 = vsel %vm129_vm0, 0.0, %v130_v17 }
  0x9a   : > { %vm138_vm2 = vweird.f32 %v132_v14  ;;  %v150_v28 = vsub.f32 %v149_v22, %v131_v23 }
  0x9b   : > { %v145_v25 = vor.u32 1.1754944e-38, %v144_v19  ;;  %vm143_vm4 = vcmp.eq.f32.partialorder %v142_v21, 8.507059e+37 }
  0x9f   : > { %v224_v15 = vpop.eup %223 }
  0xa0   : > { %v134_v16 = vmul.f32 %v224_v15, %v132_v14  ;;  %vm139_vm1 = vweird.f32 %v224_v15 }
  0xa1   : > { %vm140_vm3 = vmor %vm138_vm2, %vm139_vm1 }
  0xa2   : > { %v135_v18 = vsub.f32 1.0, %v134_v16 }
  0xa4   : > { %v136_v20 = vmul.f32 %v224_v15, %v135_v18 }
  0xa6   : > { %v137_v24 = vadd.f32 %v224_v15, %v136_v20 }
  0xa8   : > { %v141_v26 = vsel %vm140_vm3, %v224_v15, %v137_v24 }
  0xa9   : > { %v146_v27 = vsel %vm143_vm4, %v145_v25, %v141_v26 }
  0xaa   : > { %v148_v29 = vsel %vm129_vm0, 0.5, %v146_v27 }
  0xab   : > { %v151_v30 = vmul.f32 %v150_v28, %v148_v29 }
  0xad   : > { %152 = vst [vmem:[%s111_s14] sm:$0xff] %v151_v30 }
  0xae PF: > { %s11_s6 = sadd.s32 1, %s231_s6  }
  0xaf   : > { %p8_p4 = scmp.ge.s32.totalorder %s11_s6, 4  }
  0xb1   :  { %10 = sbr.rel (!%p8_p4) target bundleno = 1 (0x1), region = 54 }

</bundles_post_ra>
